<compile_context>
chip_gen: v6e
topology: v6e:2x2x1
jax: 0.10.0
libtpu: 0.0.40
codegen_flags: <defaults>
</compile_context>

<pallas_src>
import functools

import jax
import jax.numpy as jnp
import numpy as np
from jax import lax
from jax.experimental import pallas as pl
from jax.experimental.pallas import tpu as pltpu


def _cdiv(a, b):
    return -(-a // b)


def _round_up(x, m):
    return _cdiv(x, m) * m


def _round_down(x, m):
    return (x // m) * m


def _edge_dice_kernel(pre_ref, gt_ref, num_ref, den_ref, mae_ref, *,
                      bc, hw, tb, th, chunk, n_chunks, unroll,
                      mask_rows, mask_lanes):
    r = pl.program_id(0)
    hh = pl.program_id(1)

    def partials(start, lane_masked):
        # start: lane offset (multiple of `chunk`) inside this (tb, th) tile.
        p = pre_ref[:, pl.ds(start, chunk)].astype(jnp.float32)
        g = gt_ref[:, pl.ds(start, chunk)].astype(jnp.float32)
        if lane_masked:
            lanes = hh * th + start + lax.broadcasted_iota(
                jnp.int32, (tb, chunk), 1)
            ok = lanes < hw
            p = jnp.where(ok, p, 0.0)
            g = jnp.where(ok, g, 0.0)
        d = p - g
        return d * d, p * p + g * g, jnp.abs(g * (p - 1.0))

    def add3(a3, b3):
        return (a3[0] + b3[0], a3[1] + b3[1], a3[2] + b3[2])

    def run(lane_masked):
        z = jnp.zeros((tb, chunk), jnp.float32)
        carry = (z, z, z)
        if n_chunks <= unroll:
            # Short rows: fully static unroll, everything stays in vregs.
            for j in range(n_chunks):
                carry = add3(carry, partials(j * chunk, lane_masked))
        else:
            n_grp = n_chunks // unroll

            def group(gi, c):
                base = pl.multiple_of(gi * (unroll * chunk), unroll * chunk)
                for u in range(unroll):
                    c = add3(c, partials(base + u * chunk, lane_masked))
                return c

            carry = lax.fori_loop(0, n_grp, group, carry)
            # Static tail (< unroll chunks).
            for t in range(n_chunks - n_grp * unroll):
                carry = add3(
                    carry, partials((n_grp * unroll + t) * chunk, lane_masked))
        return carry

    def finish(vals):
        num, den, mae = vals
        if mask_rows:
            # Applied to the already reduced (tb, chunk) partials -> ~free.
            rows = r * tb + lax.broadcasted_iota(jnp.int32, (tb, chunk), 0)
            rv = rows < bc
            num = jnp.where(rv, num, 0.0)
            den = jnp.where(rv, den, 0.0)
            mae = jnp.where(rv, mae, 0.0)
        num_ref[...] = num
        den_ref[...] = den
        mae_ref[...] = mae

    if mask_lanes:
        last = hh == pl.num_programs(1) - 1

        @pl.when(last)
        def _():
            finish(run(True))

        @pl.when(jnp.logical_not(last))
        def _():
            finish(run(False))
    else:
        finish(run(False))


def edge_dice_loss(pre, gt, a=1.0, b=3.0, eps=2.2204e-16):
    """Pallas implementation of EdgeDiceLoss.forward(pre, gt) -> scalar."""
    assert pre.shape == gt.shape and pre.ndim == 4
    bsz, c, h, w = pre.shape
    BC = bsz * c
    HW = h * w

    # Free reshape; no astype / pad (extra HBM passes) in the wrapper.
    pre2 = pre.reshape(BC, HW)
    gt2 = gt.reshape(BC, HW)

    itemsize = np.dtype(pre.dtype).itemsize
    sub = max(8, 32 // max(1, itemsize))     # 8 (f32), 16 (bf16), 32 (int8)

    # --- generation-aware VMEM budget --------------------------------------
    try:
        vmem_cap = int(pltpu.get_tpu_info().vmem_capacity_bytes)
    except Exception:
        vmem_cap = 64 * 1024 * 1024          # conservative (v7x-sized) fallback
    target = max(2 * 1024 * 1024, vmem_cap // 16)       # bytes per input tile
    vmem_limit = int(max(vmem_cap // 2, 4 * target + (16 << 20)))

    # --- tile sizing --------------------------------------------------------
    # Rows: keep TB modest so the per-chunk working set is register sized.
    TB = min(_round_up(BC, sub), max(sub, 32))

    # Lanes: spend the remaining budget on the hw axis, balanced across tiles.
    CHUNK = 128 if HW >= 128 else HW
    th_budget = max(CHUNK, _round_down(target // (TB * itemsize), CHUNK))
    nh = _cdiv(HW, th_budget)
    TH = _round_up(_cdiv(HW, nh), CHUNK)
    nr = _cdiv(BC, TB)
    nh = _cdiv(HW, TH)

    # Megacore (v7x has 2 TensorCores): make sure there are >= 2 grid cells.
    if nr * nh == 1:
        if BC > sub:
            TB = _round_up(_cdiv(BC, 2), sub)
            nr = _cdiv(BC, TB)
        elif HW > CHUNK:
            TH = _round_up(_cdiv(HW, 2), CHUNK)
            nh = _cdiv(HW, TH)

    n_chunks = TH // CHUNK
    mask_rows = (BC % TB) != 0
    mask_lanes = (HW % TH) != 0

    kernel = functools.partial(
        _edge_dice_kernel, bc=BC, hw=HW, tb=TB, th=TH, chunk=CHUNK,
        n_chunks=n_chunks, unroll=8,
        mask_rows=mask_rows, mask_lanes=mask_lanes)

    out_sds = jax.ShapeDtypeStruct((nr * TB, nh * CHUNK), jnp.float32)
    num_p, den_p, mae_p = pl.pallas_call(
        kernel,
        out_shape=(out_sds, out_sds, out_sds),
        grid_spec=pltpu.PrefetchScalarGridSpec(
            num_scalar_prefetch=0,
            grid=(nr, nh),
            in_specs=[
                pl.BlockSpec((TB, TH), lambda rr, hi: (rr, hi)),
                pl.BlockSpec((TB, TH), lambda rr, hi: (rr, hi)),
            ],
            out_specs=[
                pl.BlockSpec((TB, CHUNK), lambda rr, hi: (rr, hi)),
                pl.BlockSpec((TB, CHUNK), lambda rr, hi: (rr, hi)),
                pl.BlockSpec((TB, CHUNK), lambda rr, hi: (rr, hi)),
            ],
        ),
        compiler_params=pltpu.CompilerParams(
            dimension_semantics=("parallel", "parallel"),
            vmem_limit_bytes=vmem_limit,
        ),
    )(pre2, gt2)

    # Tiny final combine in the wrapper (padded rows/lanes contribute zeros).
    num_r = jnp.sum(num_p, axis=1)
    den_r = jnp.sum(den_p, axis=1)
    dice = num_r / (den_r + eps)
    mean_dice = jnp.sum(dice) / float(BC)
    # Faithful to the PyTorch forward: |.|/(h*w) followed by mean over b*c*h*w.
    mean_mae = jnp.sum(mae_p) / (float(BC) * float(HW) * float(HW))
    return a * mean_dice + b * mean_mae


def edge_dice_loss_ref(pre, gt, a=1.0, b=3.0, eps=2.2204e-16):
    """Pure-JAX reference mirroring the PyTorch forward exactly."""
    bsz, c, h, w = pre.shape
    numerator = (pre - gt) ** 2
    pre_sum = jnp.sum(pre.reshape(bsz, c, -1) ** 2, axis=2)
    gt_sum = jnp.sum(gt.reshape(bsz, c, -1) ** 2, axis=2)
    numer_sum = jnp.sum(numerator.reshape(bsz, c, -1), axis=2)
    denom_sum = pre_sum + gt_sum
    loss_dice = numer_sum / (denom_sum + eps)
    pre_e = pre - pre * gt
    gt_e = -(gt - 1) * pre + gt - pre * gt
    denominator = jnp.abs(pre_e - gt_e)
    loss_mae = denominator / (h * w)
    return a * jnp.mean(loss_dice) + b * jnp.mean(loss_mae)


if __name__ == "__main__":
    # Module __init__ has no learned parameters; a=1, b=3, eps fixed constants.
    key = jax.random.PRNGKey(0)
    k0, k1, k2 = jax.random.split(key, 3)

    def make_inputs(shape, dtype, k):
        ka, kb = jax.random.split(k)
        # "pre" like a sigmoid prediction, "gt" like a binary mask.
        pre_ = jax.nn.sigmoid(jax.random.normal(ka, shape, jnp.float32)).astype(dtype)
        gt_ = (jax.random.uniform(kb, shape) > 0.5).astype(dtype)
        return pre_, gt_

    # 1) canonical aligned float32 case.
    pre, gt = make_inputs((2, 4, 16, 16), jnp.float32, k0)
    out = jax.block_until_ready(edge_dice_loss(pre, gt, a=1.0, b=3.0))
    ref = jax.block_until_ready(edge_dice_loss_ref(pre, gt, a=1.0, b=3.0))
    assert np.allclose(np.asarray(out), np.asarray(ref), rtol=1e-5, atol=1e-6), \
        (float(out), float(ref))

    # 2) ragged shapes (exercises row + lane edge-tile masking paths).
    pre_r, gt_r = make_inputs((2, 3, 10, 13), jnp.float32, k1)
    out_r = jax.block_until_ready(edge_dice_loss(pre_r, gt_r, a=1.0, b=3.0))
    ref_r = jax.block_until_ready(edge_dice_loss_ref(pre_r, gt_r, a=1.0, b=3.0))
    assert np.allclose(np.asarray(out_r), np.asarray(ref_r), rtol=1e-5, atol=1e-6), \
        (float(out_r), float(ref_r))

    # 3) bf16 inputs (exercises dtype-aware tile sizing; math still in f32).
    pre_b, gt_b = make_inputs((2, 4, 16, 16), jnp.bfloat16, k2)
    out_b = jax.block_until_ready(edge_dice_loss(pre_b, gt_b, a=1.0, b=3.0))
    ref_b = jax.block_until_ready(
        edge_dice_loss_ref(pre_b.astype(jnp.float32), gt_b.astype(jnp.float32),
                           a=1.0, b=3.0))
    assert np.allclose(np.asarray(out_b), np.asarray(ref_b), rtol=1e-4, atol=1e-5), \
        (float(out_b), float(ref_b))

    print("KERNEL_OK")
</pallas_src>

<mosaic_0001>
module attributes {stable_mosaic.version = 11 : i64} {
  func.func @_edge_dice_kernel(%arg0: i32, %arg1: i32, %arg2: memref<8x128xf32, #tpu.memory_space<vmem>>, %arg3: memref<8x128xf32, #tpu.memory_space<vmem>>, %arg4: memref<8x128xf32, #tpu.memory_space<vmem>>, %arg5: memref<8x128xf32, #tpu.memory_space<vmem>>, %arg6: memref<8x128xf32, #tpu.memory_space<vmem>>) attributes {dimension_semantics = [#tpu.dimension_semantics<parallel>, #tpu.dimension_semantics<parallel>], iteration_bounds = array<i64: 1, 2>, scalar_prefetch = 0 : i64, scratch_operands = 0 : i64, tpu.core_type = #tpu.core_type<tc>, window_params = [{transform_indices = @transform_0, window_bounds = array<i64: 8, 128>}, {transform_indices = @transform_1, window_bounds = array<i64: 8, 128>}, {transform_indices = @transform_2, window_bounds = array<i64: 8, 128>}, {transform_indices = @transform_3, window_bounds = array<i64: 8, 128>}, {transform_indices = @transform_4, window_bounds = array<i64: 8, 128>}]} {
    %cst = arith.constant 0.000000e+00 : f32
    %0 = vector.broadcast %cst : f32 to vector<8x128xf32>
    %c0 = arith.constant 0 : index
    %c0_0 = arith.constant 0 : index
    %1 = vector.load %arg2[%c0, %c0_0] : memref<8x128xf32, #tpu.memory_space<vmem>>, vector<8x128xf32>
    %c0_1 = arith.constant 0 : index
    %c0_2 = arith.constant 0 : index
    %2 = vector.load %arg3[%c0_1, %c0_2] : memref<8x128xf32, #tpu.memory_space<vmem>>, vector<8x128xf32>
    %3 = arith.subf %1, %2 : vector<8x128xf32>
    %4 = arith.mulf %3, %3 : vector<8x128xf32>
    %5 = arith.mulf %1, %1 : vector<8x128xf32>
    %6 = arith.mulf %2, %2 : vector<8x128xf32>
    %7 = arith.addf %5, %6 : vector<8x128xf32>
    %cst_3 = arith.constant 1.000000e+00 : f32
    %8 = vector.broadcast %cst_3 : f32 to vector<8x128xf32>
    %9 = arith.subf %1, %8 : vector<8x128xf32>
    %10 = arith.mulf %2, %9 : vector<8x128xf32>
    %11 = math.absf %10 : vector<8x128xf32>
    %12 = arith.addf %0, %4 : vector<8x128xf32>
    %13 = arith.addf %0, %7 : vector<8x128xf32>
    %14 = arith.addf %0, %11 : vector<8x128xf32>
    %c0_4 = arith.constant 0 : index
    %c0_5 = arith.constant 0 : index
    %15 = vector.load %arg4[%c0_4, %c0_5] : memref<8x128xf32, #tpu.memory_space<vmem>>, vector<8x128xf32>
    tpu.vector_store %arg4[%c0_4, %c0_5], %12 {strides = array<i32>} : memref<8x128xf32, #tpu.memory_space<vmem>>, vector<8x128xf32>,
    %c0_6 = arith.constant 0 : index
    %c0_7 = arith.constant 0 : index
    %16 = vector.load %arg5[%c0_6, %c0_7] : memref<8x128xf32, #tpu.memory_space<vmem>>, vector<8x128xf32>
    tpu.vector_store %arg5[%c0_6, %c0_7], %13 {strides = array<i32>} : memref<8x128xf32, #tpu.memory_space<vmem>>, vector<8x128xf32>,
    %c0_8 = arith.constant 0 : index
    %c0_9 = arith.constant 0 : index
    %17 = vector.load %arg6[%c0_8, %c0_9] : memref<8x128xf32, #tpu.memory_space<vmem>>, vector<8x128xf32>
    tpu.vector_store %arg6[%c0_8, %c0_9], %14 {strides = array<i32>} : memref<8x128xf32, #tpu.memory_space<vmem>>, vector<8x128xf32>,
    return
  }
  func.func @transform_0(%arg0: i32, %arg1: i32) -> (i32, i32) {
    %c0_i32 = arith.constant 0 : i32
    return %arg0, %arg1 : i32, i32
  }
  func.func @transform_1(%arg0: i32, %arg1: i32) -> (i32, i32) {
    %c0_i32 = arith.constant 0 : i32
    return %arg0, %arg1 : i32, i32
  }
  func.func @transform_2(%arg0: i32, %arg1: i32) -> (i32, i32) {
    %c0_i32 = arith.constant 0 : i32
    return %arg0, %arg1 : i32, i32
  }
  func.func @transform_3(%arg0: i32, %arg1: i32) -> (i32, i32) {
    %c0_i32 = arith.constant 0 : i32
    return %arg0, %arg1 : i32, i32
  }
  func.func @transform_4(%arg0: i32, %arg1: i32) -> (i32, i32) {
    %c0_i32 = arith.constant 0 : i32
    return %arg0, %arg1 : i32, i32
  }
}

</mosaic_0001>

<bundles_post_ra>
// kernel: tpu_custom_call.1
= control target key start
LH: loop header
LB: loop body
LE: loop exit
PB: predicated region body
PF: predicated region fallthrough
CT: control target
= control target key end

     0   :  { %s1117_s0 = inlined_call_operand.hbm [shape: f32[8,256], index: 0, kind: input, shape index: {}]   ;;  %s1118_s1 = inlined_call_operand.hbm [shape: f32[8,256], index: 1, kind: input, shape index: {}]   ;;  %s1119_s2 = inlined_call_operand.hbm [shape: f32[8,256], index: 2, kind: output, shape index: {0}]   ;;  %s1120_s3 = inlined_call_operand.hbm [shape: f32[8,256], index: 3, kind: output, shape index: {1}]   ;;  %s1121_s4 = inlined_call_operand.hbm [shape: f32[8,256], index: 4, kind: output, shape index: {2}]  }
   0x1   :  { %1124 = sst [smem:[#allocation15_spill]] %s1117_s0 }
   0x2   :  { %1125 = sst [smem:[#allocation16_spill]] %s1118_s1 }
   0x3   :  { %10 = vsyncpa [#allocation3], 0 }
   0x4   :  { %12 = vsyncpa [#allocation3 + $0x1], 0 }
   0x5   :  { %13 = vsyncpa [#allocation6], 0 }
   0x6   :  { %15 = vsyncpa [#allocation6 + $0x1], 0 }
   0x7   :  { %16 = vsyncpa [#allocation4], 0 }
   0x8   :  { %18 = vsyncpa [#allocation4 + $0x1], 0 }
   0x9   :  { %19 = vsyncpa [#allocation9], 0 }
   0xa   :  { %21 = vsyncpa [#allocation9 + $0x1], 0  ;;  %s866_s15 = smov 0   ;;  %s868_s16 = smov 0  }
   0xb   :  { %s870_s17 = smov 0   ;;  %s872_s18 = smov 0  }
   0xc   :  { %s874_s19 = smov 0   ;;  %s876_s20 = smov 0  }
   0xd LB: > { %s897_s21 = sadd.s32 4294967295, %s834_s20   ;;  %s1122_s22 = sadd.s32 4294967294, %s834_s20   ;;  %s834_s20 = sphi %s876_s20, %s27_s20   ;;  %s830_s19 = sphi %s874_s19, %s1141_s19   ;;  %s826_s18 = sphi %s872_s18, %s1140_s18   ;;  %s822_s17 = sphi %s870_s17, %s1139_s17   ;;  %s818_s16 = sphi %s868_s16, %s1138_s16   ;;  %s814_s15 = sphi %s866_s15, %s1137_s15  }
   0xe   : > { %s36_s23 = sadd.s32 1, %s830_s19  ;;  %s48_s24 = sadd.s32 1, %s822_s17 }
   0xf   : > { %p37_p0 = scmp.ge.s32.totalorder %s36_s23, 2  ;;  %p55_p1 = scmp.ne.s32.totalorder %s822_s17, %s818_s16 }
  0x10   : > { %p56_p2 = scmp.eq.s32.totalorder %s834_s20, 0  ;;  %p61_p3 = scmp.ne.s32.totalorder %s818_s16, %s814_s15 }
  0x11   : > { %s1143_s23 = smov (%p37_p0, %s36_s23), 0  ;;  %p62_p5 = scmp.eq.s32.totalorder %s897_s21, 0 }
  0x12   : > { %p909_p4 = por %p56_p2, %p55_p1  ;;  %s44_s26 = ssub.s32 %s830_s19, %s1143_s23 }
  0x13   : > { %p115_p6 = scmp.eq.s32.totalorder %s897_s21, 1  ;;  %p46_p7 = scmp.eq.s32.totalorder %s44_s26, 0 }
  0x14   : > { %p917_p8 = por %p62_p5, %p61_p3  ;;  %p121_p10 = scmp.eq.s32.totalorder %s1122_s22, 1 }
  0x15   : > { %p921_p9 = por %p115_p6, %p55_p1  ;;  %p588_p13 = scmp.lt.s32.totalorder %s834_s20, 2 }
  0x16   : > { %s928_s29 = scalar_select %p46_p7, %s822_s17, %s48_s24  }
  0x17   : > { %p930_p11 = por %p121_p10, %p61_p3  ;;  %s937_s5 = sand.u32 1, %s822_s17  }
  0x18   : > { %s542_s6 = sshll.u32 %s937_s5, 3  ;;  %s543_s7 = sshll.u32 %s830_s19, 7 }
  0x19   : > { %s1130_s0 = sld [smem:[#allocation15_spill]]  ;;  %s201_s11 = scalar_lea.vmem [#allocation2], %s542_s6 }
  0x1a   : > { %s210_s12 = sshll.u32 %s201_s11, 4  ;;  %p946_p0 = pnand %p588_p13, %p909_p4  ;;  %s211_s12 = int_to_ptr.vmem [resolvable:$true] %s210_s12 }
  0x1b   : > { %p546_p1 = scmp.ge.s32.totalorder %s834_s20, 1  ;;  %p235_p2 = scmp.lt.s32.totalorder %s834_s20, 3 }
  0x1c   : > { %s198_s14 = scalar_lea.sflag [#allocation3], %s937_s5  ;;  %p640_p3 = pneg %p946_p0 }
  0x1d   : > { %s651_s24 = scalar_lea.vmem %s211_s12, 128  ;;  %s836_s26 = smov [#allocation2]  }
  0x1e   : > { %p652_p5 = scmp.ne.s32.totalorder %s211_s12, %s651_s24  ;;  %s656_s8 = sshll.u32 %s836_s26, 4  ;;  %s657_s8 = int_to_ptr.vmem [resolvable:$false] %s656_s8 }
  0x1f   : > { %s208_s10 = scalar_lea.hbm %s1130_s0, %s543_s7  ;;  %s658_s25 = scalar_lea.vmem %s657_s8, 256 }
  0x20   : > { %p654_p6 = pnand %p652_p5, %p640_p3  ;;  %p659_p4 = scmp.lt.s32.totalorder %s211_s12, %s657_s8 }
  0x21   : > { %p660_p10 = scmp.lt.s32.totalorder %s658_s25, %s651_s24 }
  0x22   : > { %p655_p7 = pneg %p654_p6 }
  0x23   : > { %p661_p13 = por %p660_p10, %p659_p4 }
  0x25   : > { %p662_p12 = pnand %p661_p13, %p655_p7 }
  0x27   : > { %665 = shalt.err (!%p662_p12)
}
  0x28   : > { %574 = dma.hbm_to_vmem [thread:$0]  (!%p946_p0), %s208_s10, 128, %s211_s12, %s198_s14  }
  0x29   : > { %p964_p5 = pnand %p546_p1, %p235_p2  ;;  %s1133_s1 = sld [smem:[#allocation16_spill]] }
  0x2a   : > { %s221_s8 = scalar_lea.vmem [#allocation5], %s542_s6  ;;  %s218_s22 = scalar_lea.sflag [#allocation6], %s937_s5 }
  0x2b   : > { %s230_s25 = sshll.u32 %s221_s8, 4  ;;  %s837_s10 = smov [#allocation5]   ;;  %s231_s25 = int_to_ptr.vmem [resolvable:$true] %s230_s25 }
  0x2c   : > { %s679_s0 = scalar_lea.vmem %s231_s25, 128  ;;  %s684_s12 = sshll.u32 %s837_s10, 4  ;;  %s685_s12 = int_to_ptr.vmem [resolvable:$false] %s684_s12 }
  0x2d   : > { %p680_p12 = scmp.ne.s32.totalorder %s231_s25, %s679_s0  ;;  %s686_s14 = scalar_lea.vmem %s685_s12, 256 }
  0x2e   : > { %p687_p1 = scmp.lt.s32.totalorder %s231_s25, %s685_s12  ;;  %p688_p2 = scmp.lt.s32.totalorder %s686_s14, %s679_s0 }
  0x2f   : > { %s228_s24 = scalar_lea.hbm %s1133_s1, %s543_s7  ;;  %p682_p6 = pnand %p680_p12, %p640_p3 }
  0x30   : > { %p689_p4 = por %p688_p2, %p687_p1 }
  0x31   : > { %p683_p7 = pneg %p682_p6 }
  0x33   : > { %p690_p10 = pnand %p689_p4, %p683_p7 }
  0x35   : > { %693 = shalt.err (!%p690_p10)
}
  0x36   : > { %577 = dma.hbm_to_vmem [thread:$0]  (!%p946_p0), %s228_s24, 128, %s231_s25, %s218_s22  }
  0x37   : > { %239 = sbr.rel (%p964_p5) target bundleno = 133 (0x85), region = 28  ;;  %s980_s5 = sand.u32 (!%p964_p5), 1, %s818_s16  }
  0x38   : > { %s983_s6 = sshll.u32 (!%p964_p5), %s980_s5, 3  ;;  %s242_s7 = scalar_lea.sflag (!%p964_p5), [#allocation3], %s980_s5 }
  0x39   : > { %s245_s0 = scalar_lea.vmem (!%p964_p5), [#allocation2], %s983_s6 }
  0x3c   : > { %797 = dma.done.wait (%p917_p8), %s242_s7, 128  }
  0x3d   : > { %799 = vsyncadd (%p917_p8), %s242_s7, 4294967168  ;;  %s251_s22 = scalar_lea.sflag [#allocation6], %s980_s5  ;;  %s254_s13 = scalar_lea.vmem [#allocation5], %s983_s6 }
  0x3e   : > { %801 = dma.done.wait (%p917_p8), %s251_s22, 128  }
  0x3f   : > { %803 = vsyncadd (%p917_p8), %s251_s22, 4294967168  ;;  %s286_s9 = scalar_lea.vmem [#allocation8], %s983_s6  ;;  %s279_s26 = scalar_lea.vmem [#allocation7], %s983_s6  ;;  %v294_v0 = vld [vmem:[%s245_s0] sm:$0xff]  ;;  %v295_v1 = vld [vmem:[%s254_s13] sm:$0xff] }
  0x40   : > { %s351_s11 = sshll.u32 %s286_s9, 4  ;;  %s336_s24 = sshll.u32 %s279_s26, 4  ;;  %v298_v2 = vmul.f32 %v294_v0, %v294_v0  ;;  %v299_v3 = vmul.f32 %v295_v1, %v295_v1  ;;  %v296_v4 = vsub.f32 %v294_v0, %v295_v1  ;;  %v552_v5 = vadd.f32 -1.0, %v294_v0  ;;  %s1001_s11 = int_to_ptr.vmem [resolvable:$true] %s351_s11  ;;  %s1003_s24 = int_to_ptr.vmem [resolvable:$true] %s336_s24 }
  0x41   : > { %s315_s8 = sand.u32 1, %s897_s21   ;;  %s556_s25 = sshll.u32 %s826_s18, 7 }
  0x42   : > { %s1123_s27 = scalar_lea.vmem [#allocation10], %s983_s6  ;;  %v300_v6 = vadd.f32 %v299_v3, %v298_v2  ;;  %v297_v7 = vmul.f32 %v296_v4, %v296_v4  ;;  %v302_v8 = vmul.f32 %v552_v5, %v295_v1  ;;  %s1011_s18 = scalar_lea.hbm %s1120_s3, %s556_s25 }
  0x43   : > { %s366_s10 = sshll.u32 %s1123_s27, 4  ;;  %s1016_s0 = scalar_lea.hbm %s1119_s2, %s556_s25  ;;  %s1018_s10 = int_to_ptr.vmem [resolvable:$true] %s366_s10 }
  0x44   : > { %308 = vst [vmem:[%s286_s9] sm:$0xff] %v300_v6  ;;  %307 = vst [vmem:[%s279_s26] sm:$0xff] %v297_v7  ;;  %v303_v9 = vand.u32 2147483647, %v302_v8  ;;  %s1023_s27 = scalar_lea.hbm %s1121_s4, %s556_s25  ;;  %s1025_s1 = scalar_lea.sflag [#allocation9], %s315_s8 }
  0x45   : > { %s694_s12 = scalar_lea.vmem %s1001_s11, 128  ;;  %s838_s21 = smov [#allocation8]  }
  0x46   : > { %p695_p8 = scmp.ne.s32.totalorder %s1001_s11, %s694_s12  ;;  %s698_s14 = sshll.u32 %s838_s21, 4  ;;  %s699_s14 = int_to_ptr.vmem [resolvable:$false] %s698_s14 }
  0x47   : > { %s700_s9 = scalar_lea.vmem %s699_s14, 256  ;;  %p701_p13 = scmp.lt.s32.totalorder %s1001_s11, %s699_s14 }
  0x48   : > { %p696_p0 = pnand %p695_p8, %p921_p9  ;;  %p702_p5 = scmp.lt.s32.totalorder %s700_s9, %s694_s12 }
  0x4a   : > { %p697_p3 = pneg %p696_p0  ;;  %p703_p12 = por %p702_p5, %p701_p13 }
  0x4c   : > { %p704_p6 = pnand %p703_p12, %p697_p3 }
  0x4e   : > { %707 = shalt.err (!%p704_p6)
}
  0x4f   : > { %s708_s26 = scalar_lea.hbm %s1011_s18, 128  ;;  %s712_s7 = scalar_lea.hbm %s1120_s3, 256 }
  0x50   : > { %p709_p7 = scmp.ne.s32.totalorder %s1011_s18, %s708_s26  ;;  %p713_p4 = scmp.lt.s32.totalorder %s1011_s18, %s1120_s3 }
  0x51   : > { %p714_p10 = scmp.lt.s32.totalorder %s712_s7, %s708_s26 }
  0x52   : > { %p710_p1 = pnand %p709_p7, %p921_p9 }
  0x53   : > { %p715_p8 = por %p714_p10, %p713_p4 }
  0x54   : > { %p711_p2 = pneg %p710_p1 }
  0x56   : > { %p716_p0 = pnand %p715_p8, %p711_p2 }
  0x58   : > { %719 = shalt.err (!%p716_p0)
}
  0x59   : > { %566 = dma.vmem_to_hbm [thread:$0]  (%p921_p9), %s1001_s11, 128, %s1011_s18, %s1025_s1  }
  0x5a   : > { %s1134_s12 = scalar_lea.vmem [#allocation10], %s983_s6  ;;  %s311_s21 = scalar_lea.sflag [#allocation4], %s980_s5 }
  0x5b   : > { %309 = vst [vmem:[%s1134_s12] sm:$0xff] %v303_v9  ;;  %s720_s14 = scalar_lea.vmem %s1003_s24, 128  ;;  %s839_s9 = smov [#allocation7]  }
  0x5c   : > { %p721_p3 = scmp.ne.s32.totalorder %s1003_s24, %s720_s14  ;;  %s724_s26 = sshll.u32 %s839_s9, 4  ;;  %s725_s26 = int_to_ptr.vmem [resolvable:$false] %s724_s26 }
  0x5d   : > { %s726_s8 = scalar_lea.vmem %s725_s26, 256  ;;  %p727_p12 = scmp.lt.s32.totalorder %s1003_s24, %s725_s26 }
  0x5e   : > { %p722_p13 = pnand %p721_p3, %p921_p9  ;;  %p728_p6 = scmp.lt.s32.totalorder %s726_s8, %s720_s14 }
  0x60   : > { %p723_p5 = pneg %p722_p13  ;;  %p729_p7 = por %p728_p6, %p727_p12 }
  0x62   : > { %p730_p1 = pnand %p729_p7, %p723_p5 }
  0x64   : > { %733 = shalt.err (!%p730_p1)
}
  0x65   : > { %s734_s6 = scalar_lea.hbm %s1016_s0, 128  ;;  %s738_s18 = scalar_lea.hbm %s1119_s2, 256 }
  0x66   : > { %p735_p2 = scmp.ne.s32.totalorder %s1016_s0, %s734_s6  ;;  %p739_p8 = scmp.lt.s32.totalorder %s1016_s0, %s1119_s2 }
  0x67   : > { %p740_p0 = scmp.lt.s32.totalorder %s738_s18, %s734_s6 }
  0x68   : > { %p736_p4 = pnand %p735_p2, %p921_p9 }
  0x69   : > { %p741_p3 = por %p740_p0, %p739_p8 }
  0x6a   : > { %p737_p10 = pneg %p736_p4 }
  0x6c   : > { %p742_p13 = pnand %p741_p3, %p737_p10 }
  0x6e   : > { %745 = shalt.err (!%p742_p13)
}
  0x6f   : > { %565 = dma.vmem_to_hbm [thread:$0]  (%p921_p9), %s1003_s24, 128, %s1016_s0, %s311_s21  }
  0x70   : > { %s746_s22 = scalar_lea.vmem %s1018_s10, 128  ;;  %s840_s13 = smov [#allocation10]  }
  0x71   : > { %p747_p5 = scmp.ne.s32.totalorder %s1018_s10, %s746_s22  ;;  %s750_s12 = sshll.u32 %s840_s13, 4  ;;  %s751_s12 = int_to_ptr.vmem [resolvable:$false] %s750_s12 }
  0x72   : > { %s752_s14 = scalar_lea.vmem %s751_s12, 256  ;;  %p753_p7 = scmp.lt.s32.totalorder %s1018_s10, %s751_s12 }
  0x73   : > { %p748_p12 = pnand %p747_p5, %p921_p9  ;;  %p754_p1 = scmp.lt.s32.totalorder %s752_s14, %s746_s22 }
  0x75   : > { %p749_p6 = pneg %p748_p12  ;;  %p755_p2 = por %p754_p1, %p753_p7 }
  0x77   : > { %p756_p4 = pnand %p755_p2, %p749_p6 }
  0x79   : > { %759 = shalt.err (!%p756_p4)
}
  0x7a   : > { %s760_s9 = scalar_lea.hbm %s1023_s27, 128  ;;  %s764_s21 = scalar_lea.hbm %s1121_s4, 256 }
  0x7b   : > { %p761_p10 = scmp.ne.s32.totalorder %s1023_s27, %s760_s9  ;;  %p765_p3 = scmp.lt.s32.totalorder %s1023_s27, %s1121_s4 }
  0x7c   : > { %p766_p13 = scmp.lt.s32.totalorder %s764_s21, %s760_s9 }
  0x7d   : > { %p762_p8 = pnand %p761_p10, %p921_p9 }
  0x7e   : > { %p767_p5 = por %p766_p13, %p765_p3 }
  0x7f   : > { %p763_p0 = pneg %p762_p8 }
  0x81   : > { %p768_p12 = pnand %p767_p5, %p763_p0 }
  0x83   : > { %771 = shalt.err (!%p768_p12)
}
  0x84   : > { %567 = dma.vmem_to_hbm [thread:$0]  (%p921_p9), %s1018_s10, 128, %s1023_s27, %s1025_s1  }
  0x85 PF: > { %s378_s6 = sand.u32 1, %s814_s15   ;;  %p1135_p6 = scmp.ge.s32.totalorder %s834_s20, 2 }
  0x86   : > { %s379_s5 = scalar_lea.sflag [#allocation4], %s378_s6 }
  0x87   : > { %p579_p7 = pnand %p1135_p6, %p930_p11 }
  0x89   : > { %p580_p1 = pneg %p579_p7 }
  0x8b   : > { %805 = dma.done.wait (%p580_p1), %s379_s5, 128  }
  0x8c   : > { %807 = vsyncadd (%p580_p1), %s379_s5, 4294967168  ;;  %s1136_s11 = sadd.s32 4294967294, %s834_s20  }
  0x8d   : > { %s387_s18 = sand.u32 1, %s1136_s11  }
  0x8e   : > { %s388_s28 = scalar_lea.sflag [#allocation9], %s387_s18 }
  0x8f   : > { %809 = dma.done.wait (%p580_p1), %s388_s28, 256  }
  0x90   : > { %811 = vsyncadd (%p580_p1), %s388_s28, 4294967040  ;;  %s27_s20 = sadd.s32 1, %s834_s20   ;;  %s1137_s15 = smov %s818_s16 }
  0x91   : > { %p24_p9 = scmp.ge.s32.totalorder %s27_s20, 4   ;;  %s1138_s16 = smov %s822_s17 }
  0x92   : > { %s1139_s17 = smov %s928_s29  ;;  %s1140_s18 = smov %s830_s19 }
  0x93   : > { %s1141_s19 = smov %s1143_s23  ;;  %26 = sbr.rel (!%p24_p9) target bundleno = 13 (0xd), region = 118 }
  0x98   :  { %402 = vsyncpa [#allocation3], 1 }
  0x99   :  { %404 = vsyncpa [#allocation3 + $0x1], 1 }
  0x9a   :  { %405 = vsyncpa [#allocation6], 1 }
  0x9b   :  { %407 = vsyncpa [#allocation6 + $0x1], 1 }
  0x9c   :  { %408 = vsyncpa [#allocation4], 1 }
  0x9d   :  { %410 = vsyncpa [#allocation4 + $0x1], 1 }
  0x9e   :  { %411 = vsyncpa [#allocation9], 1 }
  0x9f   :  { %413 = vsyncpa [#allocation9 + $0x1], 1 }

</bundles_post_ra>
